<compile_context>
chip_gen: v7x
topology: tpu7x:2x2x1
jax: 0.10.0
libtpu: 0.0.40
codegen_flags: <defaults>
</compile_context>

<pallas_src>
import jax
import jax.numpy as jnp
from jax.experimental import pallas as pl
from jax.experimental.pallas import tpu as pltpu

LANES = 128
SUBLANES = 8                  # f32 native sublane count per vreg tile
TARGET_BLOCK_BYTES = 2 << 20  # ~2 MiB per block: amortizes the ~0.35us/step overhead
                              # (>=85% of HBM roofline) while keeping the double-buffered
                              # in+out working set ~8 MiB, safe on every generation.


def _pswish_kernel(beta_ref, x_ref, o_ref):
    # beta_ref: (1, 1) scalar in SMEM; x_ref/o_ref: (block_rows, 128) VMEM tiles.
    beta = beta_ref[0, 0]                       # loop-invariant scalar read
    x = x_ref[...].astype(jnp.float32)          # f32 math (v5e has no bf16 VPU/EUP)
    z = beta * x
    # Exact sigmoid with a single EUP transcendental: sigmoid(z) = 0.5*tanh(z/2) + 0.5.
    sig = 0.5 * jnp.tanh(0.5 * z) + 0.5
    o_ref[...] = (x * sig).astype(o_ref.dtype)  # cast on store for bf16/f16 inputs


def _sublane_tile(itemsize: int) -> int:
    # Native (sublane, 128) tile rows: 8 for 4-byte, 16 for 2-byte, 32 for 1-byte dtypes.
    return SUBLANES * max(1, 4 // max(1, itemsize))


def _pswish_pallas(x: jnp.ndarray, beta: jnp.ndarray) -> jnp.ndarray:
    orig_shape = x.shape
    orig_dtype = x.dtype
    n = x.size
    if n == 0:
        return x

    itemsize = jnp.dtype(orig_dtype).itemsize
    sub_tile = _sublane_tile(itemsize)

    x_flat = jnp.reshape(x, (-1,))
    rem = n % LANES
    padded = rem != 0
    if padded:
        # Only lane-unaligned sizes pay a (<=127 element) pad + slice; any size that is
        # a multiple of 128 (the common conv-activation case) takes no extra HBM pass.
        x_flat = jnp.pad(x_flat, (0, LANES - rem))

    rows = x_flat.size // LANES
    max_block_rows = max(
        sub_tile,
        (TARGET_BLOCK_BYTES // (LANES * itemsize)) // sub_tile * sub_tile,
    )
    if rows <= max_block_rows:
        block_rows = rows          # single full-extent block (exempt from tile rule)
    else:
        block_rows = max_block_rows  # multiple of the native sublane tile; a ragged
                                     # final grid block is masked by Pallas, no padding.
    grid = (pl.cdiv(rows, block_rows),)

    x2d = jnp.reshape(x_flat, (rows, LANES))
    beta_smem = jnp.reshape(beta.astype(jnp.float32), (1, 1))

    out2d = pl.pallas_call(
        _pswish_kernel,
        out_shape=jax.ShapeDtypeStruct((rows, LANES), orig_dtype),
        grid_spec=pltpu.PrefetchScalarGridSpec(
            num_scalar_prefetch=0,
            grid=grid,
            in_specs=[
                pl.BlockSpec(memory_space=pltpu.SMEM),               # beta scalar
                pl.BlockSpec((block_rows, LANES), lambda i: (i, 0)),  # x tile
            ],
            out_specs=pl.BlockSpec((block_rows, LANES), lambda i: (i, 0)),
        ),
        compiler_params=pltpu.CompilerParams(
            # TODO(synk): on v7x, CORE_PARALLEL (or a core_map mesh) guarantees both
            # TensorCores each stream half the array; "parallel" is kept here for
            # portability across v5e/v6e/v7x.
            dimension_semantics=("parallel",),
        ),
        cost_estimate=pl.CostEstimate(
            flops=5 * rows * LANES,
            transcendentals=rows * LANES,
            bytes_accessed=2 * rows * LANES * itemsize,
        ),
    )(beta_smem, x2d)

    out_flat = jnp.reshape(out2d, (-1,))
    if padded:
        out_flat = out_flat[:n]
    return jnp.reshape(out_flat, orig_shape)


# ---- trainable-beta semantics: make the op differentiable w.r.t. x and beta ---------
# TODO(synk): backward pass is analytic plain-JAX (XLA), not a fused Pallas kernel.
@jax.custom_vjp
def pswish(x: jnp.ndarray, beta: jnp.ndarray) -> jnp.ndarray:
    """Elementwise x * sigmoid(beta * x) with a scalar trainable beta (shape (1,))."""
    return _pswish_pallas(x, beta)


def _pswish_vjp_fwd(x, beta):
    return _pswish_pallas(x, beta), (x, beta)


def _pswish_vjp_bwd(res, g):
    x, beta = res
    b = beta.astype(jnp.float32)[0]
    xf = x.astype(jnp.float32)
    gf = g.astype(jnp.float32)
    sig = jax.nn.sigmoid(b * xf)
    dsig = sig * (1.0 - sig)
    dx = (gf * (sig + b * xf * dsig)).astype(x.dtype)
    dbeta = jnp.sum(gf * xf * xf * dsig).reshape(1).astype(beta.dtype)
    return dx, dbeta


pswish.defvjp(_pswish_vjp_fwd, _pswish_vjp_bwd)


if __name__ == "__main__":
    key = jax.random.PRNGKey(0)
    # NCHW input, as the PyTorch module would receive from a conv net.
    x = jax.random.normal(key, (2, 4, 16, 16), dtype=jnp.float32)
    # Parameter init matches nn.Parameter(torch.ones(size=[1])).
    beta = jnp.ones((1,), dtype=jnp.float32)

    y = jax.block_until_ready(pswish(x, beta))
    y_ref = x * jax.nn.sigmoid(x * beta[0])
    assert y.shape == x.shape and y.dtype == x.dtype
    assert jnp.allclose(y, y_ref, atol=2e-3, rtol=2e-3), float(
        jnp.max(jnp.abs(y - y_ref))
    )

    # Ragged, lane-unaligned size + non-default beta exercises the minimal-pad path.
    beta2 = jnp.asarray([1.7], dtype=jnp.float32)
    x2 = jax.random.normal(jax.random.PRNGKey(1), (3, 5, 7), dtype=jnp.float32)
    y2 = jax.block_until_ready(pswish(x2, beta2))
    y2_ref = x2 * jax.nn.sigmoid(x2 * beta2[0])
    assert y2.shape == x2.shape and y2.dtype == x2.dtype
    assert jnp.allclose(y2, y2_ref, atol=2e-3, rtol=2e-3)

    # bf16 input exercises the dtype-aware (16,128) tiling and cast-on-store.
    x3 = jax.random.normal(jax.random.PRNGKey(2), (2, 8, 16, 16), dtype=jnp.bfloat16)
    y3 = jax.block_until_ready(pswish(x3, beta))
    x3f = x3.astype(jnp.float32)
    y3_ref = (x3f * jax.nn.sigmoid(x3f * beta[0])).astype(jnp.bfloat16)
    assert y3.shape == x3.shape and y3.dtype == jnp.bfloat16
    assert jnp.allclose(
        y3.astype(jnp.float32), y3_ref.astype(jnp.float32), atol=2e-2, rtol=2e-2
    )

    # Gradients w.r.t. x and the trainable beta via the custom VJP.
    def loss_kernel(xx, bb):
        return jnp.sum(pswish(xx, bb) ** 2)

    def loss_ref(xx, bb):
        return jnp.sum((xx * jax.nn.sigmoid(xx * bb[0])) ** 2)

    gx, gb = jax.grad(loss_kernel, argnums=(0, 1))(x, beta)
    gx_ref, gb_ref = jax.grad(loss_ref, argnums=(0, 1))(x, beta)
    assert gx.shape == x.shape and gb.shape == beta.shape
    assert jnp.allclose(gx, gx_ref, atol=2e-3, rtol=2e-3)
    assert jnp.allclose(gb, gb_ref, atol=1e-2, rtol=2e-3)

    print("KERNEL_OK")
</pallas_src>

<mosaic_0001>
module attributes {stable_mosaic.version = 11 : i64} {
  func.func @_pswish_kernel(%arg0: i32, %arg1: memref<1x1xf32, #tpu.memory_space<smem>>, %arg2: memref<16x128xf32, #tpu.memory_space<vmem>>, %arg3: memref<16x128xf32, #tpu.memory_space<vmem>>) attributes {dimension_semantics = [#tpu.dimension_semantics<parallel>], iteration_bounds = array<i64: 1>, scalar_prefetch = 0 : i64, scratch_operands = 0 : i64, tpu.core_type = #tpu.core_type<tc>, window_params = [{transform_indices = @transform_0, window_bounds = array<i64: 1, 1>}, {transform_indices = @transform_1, window_bounds = array<i64: 16, 128>}, {transform_indices = @transform_2, window_bounds = array<i64: 16, 128>}]} {
    %c0 = arith.constant 0 : index
    %c0_0 = arith.constant 0 : index
    %0 = memref.load %arg1[%c0, %c0_0] : memref<1x1xf32, #tpu.memory_space<smem>>
    %c0_1 = arith.constant 0 : index
    %c0_2 = arith.constant 0 : index
    %1 = vector.load %arg2[%c0_1, %c0_2] : memref<16x128xf32, #tpu.memory_space<vmem>>, vector<16x128xf32>
    %2 = vector.broadcast %0 : f32 to vector<16x128xf32>
    %3 = arith.mulf %2, %1 : vector<16x128xf32>
    %cst = arith.constant 5.000000e-01 : f32
    %4 = vector.broadcast %cst : f32 to vector<16x128xf32>
    %5 = arith.mulf %4, %3 : vector<16x128xf32>
    %6 = math.tanh %5 : vector<16x128xf32>
    %cst_3 = arith.constant 5.000000e-01 : f32
    %7 = vector.broadcast %cst_3 : f32 to vector<16x128xf32>
    %8 = arith.mulf %7, %6 : vector<16x128xf32>
    %cst_4 = arith.constant 5.000000e-01 : f32
    %9 = vector.broadcast %cst_4 : f32 to vector<16x128xf32>
    %10 = arith.addf %8, %9 : vector<16x128xf32>
    %11 = arith.mulf %1, %10 : vector<16x128xf32>
    %c0_5 = arith.constant 0 : index
    %c0_6 = arith.constant 0 : index
    %12 = vector.load %arg3[%c0_5, %c0_6] : memref<16x128xf32, #tpu.memory_space<vmem>>, vector<16x128xf32>
    tpu.vector_store %arg3[%c0_5, %c0_6], %11 {strides = array<i32>} : memref<16x128xf32, #tpu.memory_space<vmem>>, vector<16x128xf32>,
    return
  }
  func.func @transform_0(%arg0: i32) -> (i32, i32) {
    %c0_i32 = arith.constant 0 : i32
    %c0_i32_0 = arith.constant 0 : i32
    %c0_i32_1 = arith.constant 0 : i32
    return %c0_i32, %c0_i32_0 : i32, i32
  }
  func.func @transform_1(%arg0: i32) -> (i32, i32) {
    %c0_i32 = arith.constant 0 : i32
    %c0_i32_0 = arith.constant 0 : i32
    return %arg0, %c0_i32 : i32, i32
  }
  func.func @transform_2(%arg0: i32) -> (i32, i32) {
    %c0_i32 = arith.constant 0 : i32
    %c0_i32_0 = arith.constant 0 : i32
    return %arg0, %c0_i32 : i32, i32
  }
}

</mosaic_0001>

<bundles_post_ra>
// kernel: tpu_custom_call.1
= control target key start
LH: loop header
LB: loop body
LE: loop exit
PB: predicated region body
PF: predicated region fallthrough
CT: control target
= control target key end

     0   :  { %8 = vsyncpa [#allocation4], 0  ;;  %s170_s0 = inlined_call_operand.<no memory space> [shape: f32[1,1], index: 0, kind: input, shape index: {}]   ;;  %s171_s1 = inlined_call_operand.hbm [shape: f32[16,128], index: 1, kind: input, shape index: {}]   ;;  %s172_s2 = inlined_call_operand.hbm [shape: f32[16,128], index: 2, kind: output, shape index: {}]  }
   0x1   :  { %9 = vsyncpa [#allocation5], 0  ;;  %s118_s9 = smov [#allocation3]   ;;  %s70_s13 = scalar_lea.hbm %s171_s1, 256 }
   0x2   :  { %s17_s10 = sshll.u32 %s118_s9, 4  ;;  %p71_p0 = scmp.ne.s32.totalorder %s171_s1, %s70_s13  ;;  %s18_s10 = int_to_ptr.vmem [resolvable:$true] %s17_s10 }
   0x3   :  { %p74_p1 = scmp.lt.u32.totalorder %s70_s13, %s171_s1 }
   0x5   :  { %p76_p2 = pnand %p74_p1, %p71_p0 }
   0x7   :  { %79 = shalt.err (!%p76_p2)
}
   0x8   :  { %s80_s18 = scalar_lea.vmem %s18_s10, 256  ;;  %p85_p4 = scmp.lt.s32.totalorder %s18_s10, %s18_s10 }
   0x9   :  { %p81_p3 = scmp.ne.s32.totalorder %s18_s10, %s80_s18  ;;  %p86_p5 = scmp.lt.s32.totalorder %s80_s18, %s80_s18 }
   0xb   :  { %p87_p6 = por %p86_p5, %p85_p4 }
   0xd   :  { %p88_p7 = pnand %p87_p6, %p81_p3 }
   0xf   :  { %91 = shalt.err (!%p88_p7)
}
  0x10   :  { %s119_s19 = smov 128   ;;  %s120_s20 = smov 8  }
  0x11   :  { %23 = dma.hbm_to_vmem [thread:$0]  %s171_s1, 256, %s18_s10, [#allocation4], %s119_s19, %s119_s19, %s120_s20  }
  0x12   :  { %114 = dma.done.wait [#allocation4], 256  }
  0x13   :  { %115 = vsyncadd [#allocation4], 4294967040  ;;  %v30_v0 = vstv %s170_s0  ;;  %v28_v1 = vld [vmem:[#allocation3] sm:$0xff]  ;;  %v29_v2 = vld [vmem:[#allocation3 + $0x8] sm:$0xff]  ;;  %s121_s1 = smov [#allocation6]  }
  0x14   :  { %v31_v3 = vmul.f32 %v30_v0, %v28_v1  ;;  %v32_v4 = vmul.f32 %v30_v0, %v29_v2  ;;  %s50_s25 = sshll.u32 %s121_s1, 4  ;;  %s51_s25 = int_to_ptr.vmem [resolvable:$true] %s50_s25 }
  0x15   :  { %s92_s0 = scalar_lea.vmem %s51_s25, 256  ;;  %p97_p9 = scmp.lt.s32.totalorder %s51_s25, %s51_s25 }
  0x16   :  { %v33_v5 = vmul.f32 0.5, %v31_v3  ;;  %v34_v6 = vmul.f32 0.5, %v32_v4  ;;  %p93_p8 = scmp.ne.s32.totalorder %s51_s25, %s92_s0  ;;  %p98_p10 = scmp.lt.s32.totalorder %s92_s0, %s92_s0 }
  0x18   :  { %66 = vtanh.f32 %v33_v5  ;;  %p99_p11 = por %p98_p10, %p97_p9 }
  0x19   :  { %68 = vtanh.f32 %v34_v6 }
  0x1a   :  { %p100_p12 = pnand %p99_p11, %p93_p8 }
  0x22   :  { %v67_v7 = vpop.eup %66 }
  0x23   :  { %v69_v8 = vpop.eup %68  ;;  %v37_v9 = vmul.f32 0.5, %v67_v7 }
  0x24   :  { %v38_v10 = vmul.f32 0.5, %v69_v8 }
  0x25   :  { %v39_v11 = vadd.f32 0.5, %v37_v9 }
  0x26   :  { %v40_v12 = vadd.f32 0.5, %v38_v10 }
  0x27   :  { %v41_v13 = vmul.f32 %v39_v11, %v28_v1 }
  0x28   :  { %v42_v14 = vmul.f32 %v40_v12, %v29_v2 }
  0x29   :  { %43 = vst [vmem:[#allocation6] sm:$0xff] %v41_v13 }
  0x2a   :  { %44 = vst [vmem:[#allocation6 + $0x8] sm:$0xff] %v42_v14 }
  0x2b   :  { %103 = shalt.err (!%p100_p12)
}
  0x2c   :  { %s104_s28 = scalar_lea.hbm %s172_s2, 256 }
  0x2d   :  { %p105_p13 = scmp.ne.s32.totalorder %s172_s2, %s104_s28  ;;  %p108_p0 = scmp.lt.u32.totalorder %s104_s28, %s172_s2 }
  0x2f   :  { %p110_p1 = pnand %p108_p0, %p105_p13 }
  0x31   :  { %113 = shalt.err (!%p110_p1)
}
  0x32   :  { %56 = dma.vmem_to_hbm [thread:$0]  %s51_s25, 256, %s172_s2, [#allocation5], %s119_s19, %s119_s19, %s120_s20  }
  0x33   :  { %116 = dma.done.wait [#allocation5], 256  }
  0x34   :  { %117 = vsyncadd [#allocation5], 4294967040 }
  0x35   :  { %60 = vsyncpa [#allocation4], 1 }
  0x36   :  { %61 = vsyncpa [#allocation5], 1 }

</bundles_post_ra>
